<compile_context>
chip_gen: v6e
topology: v6e:2x2x1
jax: 0.10.0
libtpu: 0.0.40
codegen_flags: <defaults>
</compile_context>

<pallas_src>
import jax
import jax.numpy as jnp
from jax.experimental import pallas as pl
from jax.experimental.pallas import tpu as pltpu


def _round_up(n, m):
    return ((n + m - 1) // m) * m


def value_decoder_kernel(x_ref, w1_ref, b1_ref, w2_ref, b2_ref, o_ref):
    # x: (TILE_B, D), w1: (D, D) already (in, out), b1: (1, D),
    # w2: (1, D) row, b2: (1, 1), o: (1, 1, TILE_B) lane-dense.
    x = x_ref[...]
    # Layer 1 on the MXU with f32 accumulation.
    h = jnp.dot(x, w1_ref[...], preferred_element_type=jnp.float32) + b1_ref[...]
    h = jnp.maximum(h, 0.0)  # ReLU (VPU)
    # Layer 2: (B,D)x(D,1) would waste the MXU; do VPU multiply + lane reduce.
    v = jnp.sum(h * w2_ref[...], axis=-1) + b2_ref[0, 0]          # (TILE_B,)
    # Lane-dense store (last dim = TILE_B), avoids masked (B,1) partial stores.
    o_ref[...] = v[None, None, :].astype(o_ref.dtype)


def prepare_params(w1, b1, w2, b2):
    """One-time parameter preparation (do this at load time, not per call).

    w1: (D, D) torch layout (out, in); b1: (D,); w2: (1, D); b2: (1,).
    """
    D = w1.shape[0]
    return (
        jnp.asarray(w1, jnp.float32).T,               # (D, D) as (in, out)
        jnp.asarray(b1, jnp.float32).reshape(1, D),   # (1, D)
        jnp.asarray(w2, jnp.float32).reshape(1, D),   # (1, D) row (no transpose)
        jnp.asarray(b2, jnp.float32).reshape(1, 1),   # (1, 1)
    )


def _pick_tile_b(B, D, vmem_budget_bytes=16 << 20):
    """Batch tile: big enough to amortize per-step overhead, small enough to
    double-buffer under v7x's 64 MiB VMEM (we budget well below that)."""
    tb = min(512, _round_up(B, 8))
    # Rough per-tile footprint: 2x double-buffered x + h live + resident W1.
    while tb > 8 and (3 * tb * D * 4 + D * D * 4) > vmem_budget_bytes:
        tb = max(8, (tb // 2) // 8 * 8)
    return tb


def value_decoder(x, params):
    """x: (B, D) f32. params: output of prepare_params(). Returns (B, 1) f32."""
    w1_t, b1_row, w2_row, b2_11 = params
    B, D = x.shape

    tb = _pick_tile_b(B, D)
    B_pad = _round_up(B, tb)
    if B_pad != B:
        x = jnp.pad(x, ((0, B_pad - B), (0, 0)))  # padded rows discarded below
    num_tiles = B_pad // tb

    out = pl.pallas_call(
        value_decoder_kernel,
        out_shape=jax.ShapeDtypeStruct((num_tiles, 1, tb), jnp.float32),
        grid_spec=pl.GridSpec(
            grid=(num_tiles,),
            in_specs=[
                pl.BlockSpec((tb, D), lambda i: (i, 0)),   # x: tiled over batch
                pl.BlockSpec((D, D), lambda i: (0, 0)),    # W1: VMEM-resident
                pl.BlockSpec((1, D), lambda i: (0, 0)),    # b1
                pl.BlockSpec((1, D), lambda i: (0, 0)),    # w2 row
                pl.BlockSpec((1, 1), lambda i: (0, 0)),    # b2
            ],
            out_specs=pl.BlockSpec((1, 1, tb), lambda i: (i, 0, 0)),
        ),
        compiler_params=pltpu.CompilerParams(
            # Batch axis is independent -> shard across TensorCores on v7x.
            dimension_semantics=("parallel",),
        ),
    )(x, w1_t, b1_row, w2_row, b2_11)

    # Free layout plumbing back to the PyTorch output shape.
    return out.reshape(B_pad, 1)[:B]


if __name__ == "__main__":
    key = jax.random.PRNGKey(0)
    B, D = 8, 32  # batch, dimension
    kx, k1, k2, k3, k4 = jax.random.split(key, 5)

    x = jax.random.normal(kx, (B, D), dtype=jnp.float32)
    # Synthetic parameters in torch nn.Linear layout: weight (out, in), bias (out,).
    bound1 = 1.0 / jnp.sqrt(D)
    w1 = jax.random.uniform(k1, (D, D), jnp.float32, -bound1, bound1)
    b1 = jax.random.uniform(k2, (D,), jnp.float32, -bound1, bound1)
    w2 = jax.random.uniform(k3, (1, D), jnp.float32, -bound1, bound1)
    b2 = jax.random.uniform(k4, (1,), jnp.float32, -bound1, bound1)

    params = prepare_params(w1, b1, w2, b2)  # hoisted: done once, not per call
    out = value_decoder(x, params)
    out = jax.block_until_ready(out)

    # Reference check in plain JAX (same math as the torch forward pass).
    ref = jnp.maximum(x @ w1.T + b1, 0.0) @ w2.T + b2
    assert out.shape == (B, 1)
    assert jnp.allclose(out, ref, atol=1e-5, rtol=1e-5)

    print("KERNEL_OK")
</pallas_src>

<mosaic_0001>
module attributes {stable_mosaic.version = 11 : i64} {
  func.func @value_decoder_kernel(%arg0: i32, %arg1: memref<8x32xf32, #tpu.memory_space<vmem>>, %arg2: memref<32x32xf32, #tpu.memory_space<vmem>>, %arg3: memref<1x32xf32, #tpu.memory_space<vmem>>, %arg4: memref<1x32xf32, #tpu.memory_space<vmem>>, %arg5: memref<1x1xf32, #tpu.memory_space<vmem>>, %arg6: memref<1x1x8xf32, #tpu.memory_space<vmem>>) attributes {dimension_semantics = [#tpu.dimension_semantics<parallel>], iteration_bounds = array<i64: 1>, scalar_prefetch = 0 : i64, scratch_operands = 0 : i64, tpu.core_type = #tpu.core_type<tc>, window_params = [{transform_indices = @transform_0, window_bounds = array<i64: 8, 32>}, {pipeline_mode = #tpu.pipeline_mode<synchronous>, transform_indices = @transform_1, window_bounds = array<i64: 32, 32>}, {pipeline_mode = #tpu.pipeline_mode<synchronous>, transform_indices = @transform_2, window_bounds = array<i64: 1, 32>}, {pipeline_mode = #tpu.pipeline_mode<synchronous>, transform_indices = @transform_3, window_bounds = array<i64: 1, 32>}, {pipeline_mode = #tpu.pipeline_mode<synchronous>, transform_indices = @transform_4, window_bounds = array<i64: 1, 1>}, {transform_indices = @transform_5, window_bounds = array<i64: 1, 1, 8>}]} {
    %c0 = arith.constant 0 : index
    %c0_0 = arith.constant 0 : index
    %0 = vector.load %arg1[%c0, %c0_0] : memref<8x32xf32, #tpu.memory_space<vmem>>, vector<8x32xf32>
    %c0_1 = arith.constant 0 : index
    %c0_2 = arith.constant 0 : index
    %1 = vector.load %arg2[%c0_1, %c0_2] : memref<32x32xf32, #tpu.memory_space<vmem>>, vector<32x32xf32>
    %cst = arith.constant dense<0.000000e+00> : vector<8x32xf32>
    %2 = tpu.matmul %0, %1, %cst {dimension_numbers = #tpu.dot_dimension_numbers<[1], [0], [0], [1], [0, 0, 1, 1], [], []>} : vector<8x32xf32>, vector<32x32xf32>, vector<8x32xf32> -> vector<8x32xf32>
    %c0_3 = arith.constant 0 : index
    %c0_4 = arith.constant 0 : index
    %3 = vector.load %arg3[%c0_3, %c0_4] : memref<1x32xf32, #tpu.memory_space<vmem>>, vector<1x32xf32>
    %4 = vector.broadcast %3 : vector<1x32xf32> to vector<8x32xf32>
    %5 = arith.addf %2, %4 : vector<8x32xf32>
    %cst_5 = arith.constant 0.000000e+00 : f32
    %6 = vector.broadcast %cst_5 : f32 to vector<8x32xf32>
    %7 = arith.maximumf %5, %6 : vector<8x32xf32>
    %c0_6 = arith.constant 0 : index
    %c0_7 = arith.constant 0 : index
    %8 = vector.load %arg4[%c0_6, %c0_7] : memref<1x32xf32, #tpu.memory_space<vmem>>, vector<1x32xf32>
    %9 = vector.broadcast %8 : vector<1x32xf32> to vector<8x32xf32>
    %10 = arith.mulf %7, %9 : vector<8x32xf32>
    %cst_8 = arith.constant dense<0.000000e+00> : vector<8xf32>
    %11 = vector.multi_reduction <add>, %10, %cst_8 [1] : vector<8x32xf32> to vector<8xf32>
    %c0_9 = arith.constant 0 : index
    %c0_10 = arith.constant 0 : index
    %12 = vector.load %arg5[%c0_9, %c0_10] : memref<1x1xf32, #tpu.memory_space<vmem>>, vector<1x1xf32>
    %13 = vector.extract %12[0, 0] : f32 from vector<1x1xf32>
    %14 = vector.broadcast %13 : f32 to vector<8xf32>
    %15 = arith.addf %11, %14 : vector<8xf32>
    %16 = vector.shape_cast %15 : vector<8xf32> to vector<1x1x8xf32>
    %c0_11 = arith.constant 0 : index
    %c0_12 = arith.constant 0 : index
    %c0_13 = arith.constant 0 : index
    %17 = vector.load %arg6[%c0_11, %c0_12, %c0_13] : memref<1x1x8xf32, #tpu.memory_space<vmem>>, vector<1x1x8xf32>
    tpu.vector_store %arg6[%c0_11, %c0_12, %c0_13], %16 {strides = array<i32>} : memref<1x1x8xf32, #tpu.memory_space<vmem>>, vector<1x1x8xf32>,
    return
  }
  func.func @transform_0(%arg0: i32) -> (i32, i32) {
    %c0_i32 = arith.constant 0 : i32
    %c0_i32_0 = arith.constant 0 : i32
    return %arg0, %c0_i32 : i32, i32
  }
  func.func @transform_1(%arg0: i32) -> (i32, i32) {
    %c0_i32 = arith.constant 0 : i32
    %c0_i32_0 = arith.constant 0 : i32
    %c0_i32_1 = arith.constant 0 : i32
    return %c0_i32, %c0_i32_0 : i32, i32
  }
  func.func @transform_2(%arg0: i32) -> (i32, i32) {
    %c0_i32 = arith.constant 0 : i32
    %c0_i32_0 = arith.constant 0 : i32
    %c0_i32_1 = arith.constant 0 : i32
    return %c0_i32, %c0_i32_0 : i32, i32
  }
  func.func @transform_3(%arg0: i32) -> (i32, i32) {
    %c0_i32 = arith.constant 0 : i32
    %c0_i32_0 = arith.constant 0 : i32
    %c0_i32_1 = arith.constant 0 : i32
    return %c0_i32, %c0_i32_0 : i32, i32
  }
  func.func @transform_4(%arg0: i32) -> (i32, i32) {
    %c0_i32 = arith.constant 0 : i32
    %c0_i32_0 = arith.constant 0 : i32
    %c0_i32_1 = arith.constant 0 : i32
    return %c0_i32, %c0_i32_0 : i32, i32
  }
  func.func @transform_5(%arg0: i32) -> (i32, i32, i32) {
    %c0_i32 = arith.constant 0 : i32
    %c0_i32_0 = arith.constant 0 : i32
    %c0_i32_1 = arith.constant 0 : i32
    return %arg0, %c0_i32, %c0_i32_0 : i32, i32, i32
  }
}

</mosaic_0001>

<bundles_post_ra>
// kernel: tpu_custom_call.1
= control target key start
LH: loop header
LB: loop body
LE: loop exit
PB: predicated region body
PF: predicated region fallthrough
CT: control target
= control target key end

     0   :  { %s326_s0 = inlined_call_operand.hbm [shape: f32[8,32], index: 0, kind: input, shape index: {}]   ;;  %s327_s1 = inlined_call_operand.hbm [shape: f32[32,32], index: 1, kind: input, shape index: {}]   ;;  %s328_s2 = inlined_call_operand.vmem [shape: f32[1,32], index: 2, kind: input, shape index: {}]   ;;  %s329_s3 = inlined_call_operand.vmem [shape: f32[1,32], index: 3, kind: input, shape index: {}]   ;;  %s330_s4 = inlined_call_operand.<no memory space> [shape: f32[1,1], index: 4, kind: input, shape index: {}]   ;;  %s331_s5 = inlined_call_operand.hbm [shape: f32[1,1,8], index: 5, kind: output, shape index: {}]  }
   0x1   :  { %v10_v0 = vstv %s330_s4 }
   0x2   :  { %11 = vst [vmem:[#allocation2] sm:$0x1] %v10_v0 }
   0x3   :  { %12 = vsyncpa [#allocation4], 0 }
   0x4   :  { %13 = vsyncpa [#allocation7], 0 }
   0x5   :  { %14 = vsyncpa [#allocation5], 0  ;;  %s271_s20 = smov [#allocation3]   ;;  %s272_s22 = smov [#allocation6]  }
   0x6   :  { %s21_s21 = sshll.u32 %s271_s20, 4  ;;  %s30_s23 = sshll.u32 %s272_s22, 4  ;;  %s22_s21 = int_to_ptr.vmem [resolvable:$true] %s21_s21  ;;  %s31_s23 = int_to_ptr.vmem [resolvable:$true] %s30_s23 }
   0x7   :  { %s213_s24 = scalar_lea.vmem %s22_s21, 128  ;;  %p218_p1 = scmp.lt.s32.totalorder %s22_s21, %s22_s21 }
   0x8   :  { %p214_p0 = scmp.ne.s32.totalorder %s22_s21, %s213_s24  ;;  %p219_p2 = scmp.lt.s32.totalorder %s213_s24, %s213_s24 }
   0xa   :  { %p220_p3 = por %p219_p2, %p218_p1 }
   0xc   :  { %p221_p4 = pnand %p220_p3, %p214_p0 }
   0xe   :  { %224 = shalt.err (!%p221_p4)
}
   0xf   :  { %24 = dma.hbm_to_vmem [thread:$0]  %s326_s0, 128, %s22_s21, [#allocation4]  }
  0x10   :  { %s233_s4 = scalar_lea.vmem %s31_s23, 512  ;;  %p238_p6 = scmp.lt.s32.totalorder %s31_s23, %s31_s23 }
  0x11   :  { %p234_p5 = scmp.ne.s32.totalorder %s31_s23, %s233_s4  ;;  %p239_p7 = scmp.lt.s32.totalorder %s233_s4, %s233_s4 }
  0x13   :  { %p240_p8 = por %p239_p7, %p238_p6 }
  0x15   :  { %p241_p9 = pnand %p240_p8, %p234_p5 }
  0x17   :  { %244 = shalt.err (!%p241_p9)
}
  0x18   :  { %s273_s27 = smov 128   ;;  %s274_s28 = smov 8  }
  0x19   :  { %36 = dma.hbm_to_vmem [thread:$0]  %s327_s1, 512, %s31_s23, [#allocation7], %s273_s27, %s273_s27, %s274_s28  }
  0x1a   :  { %265 = dma.done.wait [#allocation4], 128  }
  0x1b   :  { %266 = vsyncadd [#allocation4], 4294967168 }
  0x1c   :  { %267 = dma.done.wait [#allocation7], 512  }
  0x1d   :  { %268 = vsyncadd [#allocation7], 4294966784  ;;  %v275_v1 = vmov 0.0   ;;  %vm276_vm0 = vmmov 0   ;;  %v53_v2 = vld [vmem:[#allocation6 + $0x18] sm:$0xff]  ;;  %v52_v3 = vld [vmem:[#allocation6 + $0x10] sm:$0xff]  ;;  %v152_v16 = vlaneseq }
  0x1e   :  { %185 = vmatprep.subr.mxu0 %v275_v1  ;;  %193 = vmatprep.mubr.msk.f32.mxu0 %vm276_vm0, %v275_v1  ;;  %v51_v4 = vld [vmem:[#allocation6 + $0x8] sm:$0xff]  ;;  %v50_v5 = vld [vmem:[#allocation6] sm:$0xff]  ;;  %v49_v6 = vld [vmem:[#allocation3] sm:$0xff]  ;;  %vm61_vm1 = vcmask 261120   ;;  %s277_s9 = smov [#allocation8]   ;;  %vm159_vm2 = vcmask 57344  }
  0x1f   :  { %186 = vmatpush3.msra.mxu0 %v53_v2  ;;  %v147_v7 = vld [vmem:[#allocation2] sm:$0x1]  ;;  %v153_v17 = vand.u32 127, %v152_v16  ;;  %v155_v18 = vshrl.u32 %v152_v16, 7 }
  0x20   :  { %187 = vmatprep.subr.mxu0 %v275_v1  ;;  %196 = vpush %v147_v7  ;;  %v177_v8 = vld [vmem:[%s328_s2] ss:$0 sm:$0xff]  ;;  %s167_s2 = sshll.u32 %s277_s9, 4  ;;  %s168_s2 = int_to_ptr.vmem [resolvable:$true] %s167_s2 }
  0x21   :  { %188 = vmatpush3.msra.mxu0 %v52_v3  ;;  %v179_v12 = vld [vmem:[%s329_s3] ss:$0 sm:$0xff]  ;;  %v156_v20 = vsub.s32 %v153_v17, %v155_v18  ;;  %s245_s10 = scalar_lea.vmem %s168_s2, 16  ;;  %s249_s3 = scalar_lea.vmem %s168_s2, 32 }
  0x22   :  { %189 = vmatprep.subr.mxu0 %v275_v1  ;;  %p246_p10 = scmp.ne.s32.totalorder %s168_s2, %s245_s10  ;;  %p250_p11 = scmp.lt.s32.totalorder %s168_s2, %s168_s2 }
  0x23   :  { %190 = vmatpush3.msra.mxu0 %v51_v4  ;;  %p251_p12 = scmp.lt.s32.totalorder %s249_s3, %s245_s10 }
  0x24   :  { %191 = vmatprep.subr.mxu0 %v275_v1 }
  0x25   :  { %192 = vmatpush3.msra.mxu0 %v50_v5  ;;  %p252_p13 = por %p251_p12, %p250_p11 }
  0x26   :  { %194 = vmatmul.mubr.msk.f32.vlgmr.msra.gmra.mxu0 %vm61_vm1, %v49_v6 }
  0x27   :  { %p253_p0 = pnand %p252_p13, %p246_p10 }
  0x51   :  { %s197_s8 = spop %196 }
  0x52   :  { %v149_v19 = vstv %s197_s8 }
  0xe6   :  { %v131_v9 = vpop.f32.mrf.mxu0 }
  0xe7   :  { %v132_v10 = vadd.f32 %v177_v8, %v131_v9 }
  0xe8   :  { %v195_v11 = vpop.f32.mrf.mxu0 }
  0xe9   :  { %v135_v13 = vmax.f32 %v132_v10, 0.0 }
  0xeb   :  { %v143_v14 = vmul.f32 %v179_v12, %v135_v13 }
  0xed   :  { %v144_v15 = vsel %vm61_vm1, %v143_v14, 0.0 }
  0xee   :  { %145 = vadd.xlane.f32.xlu0 %v144_v15 }
 0x177   :  { %v146_v21 = vpop.xlane.xlu0 %145 }
 0x178   :  { %v150_v22 = vadd.f32 %v149_v19, %v146_v21 }
 0x17a   :  { %v157_v23 = vrot.slane %v150_v22, %v156_v20 }
 0x17c   :  { %160 = vst.msk [vmem:[#allocation8] sm:$0x1] %vm159_vm2, %v157_v23 }
 0x17d   :  { %256 = shalt.err (!%p253_p0)
}
 0x17e   :  { %170 = dma.vmem_to_hbm [thread:$0]  %s168_s2, 16, %s331_s5, [#allocation5]  }
 0x17f   :  { %269 = dma.done.wait [#allocation5], 16  }
 0x180   :  { %270 = vsyncadd [#allocation5], 4294967280 }
 0x181   :  { %174 = vsyncpa [#allocation4], 1 }
 0x182   :  { %175 = vsyncpa [#allocation7], 1 }
 0x183   :  { %176 = vsyncpa [#allocation5], 1 }

</bundles_post_ra>
